<compile_context>
chip_gen: v7x
topology: tpu7x:2x2x1
jax: 0.10.0
libtpu: 0.0.40
codegen_flags: <defaults>
</compile_context>

<pallas_src>
import functools

import jax
import jax.numpy as jnp
from jax.experimental import pallas as pl
from jax.experimental.pallas import tpu as pltpu


def _sawb_multibit_kernel(x_ref, o_ref, *, n_bits, base0, out_dtype):
    """Elementwise multi-bit decomposition on one tile.

    x_ref: (tile_rows, lane) f32 input tile in VMEM.
    o_ref: (n_bits, tile_rows, lane) output tile (one 0/1 bit plane per bit).
    """
    remain = x_ref[...]
    base = base0  # static Python float; n_bits is tiny so the loop unrolls
    for i in range(n_bits):
        bit = (remain >= base).astype(jnp.float32)
        o_ref[i, :, :] = bit.astype(out_dtype)
        remain = remain - bit * base
        base = base / 2.0


_LANE = 512              # lane-dense last dim (multiple of 128)
_TARGET_TILE_ROWS = 512  # 512 x 512 f32 input tile == 1 MiB


def sawb_multibit(x, n_bits=2, base_w=None, out_dtype=jnp.float32):
    """JAX/Pallas equivalent of SAWB_MultiBit.forward.

    Returns a list of n_bits arrays (dtype `out_dtype`, values exactly 0/1),
    each with the same shape as `x`.
    """
    if base_w is not None:
        base0 = float(base_w)
    else:
        base0 = 2.0 ** (n_bits - 1) / (2.0 ** n_bits - 1.0)

    orig_shape = x.shape
    x_flat = x.reshape(-1).astype(jnp.float32)
    n = x_flat.shape[0]

    lane = _LANE
    rows_needed = -(-n // lane)                    # ceil(n / lane)
    rows_aligned = -(-rows_needed // 8) * 8        # sublane multiple of 8
    tile_rows = min(_TARGET_TILE_ROWS, rows_aligned)
    grid = -(-rows_needed // tile_rows)
    rows = grid * tile_rows
    padded = rows * lane

    # Ragged tail only: for typical conv tensors (size % block == 0) this is
    # skipped entirely, avoiding an extra HBM read+write pass.
    if padded != n:
        x_flat = jnp.pad(x_flat, (0, padded - n))
    x2 = x_flat.reshape(rows, lane)

    out_itemsize = jnp.dtype(out_dtype).itemsize
    kernel = functools.partial(
        _sawb_multibit_kernel, n_bits=n_bits, base0=base0, out_dtype=out_dtype)

    out = pl.pallas_call(
        kernel,
        out_shape=jax.ShapeDtypeStruct((n_bits, rows, lane), out_dtype),
        grid=(grid,),
        in_specs=[pl.BlockSpec((tile_rows, lane), lambda i: (i, 0))],
        out_specs=pl.BlockSpec((n_bits, tile_rows, lane), lambda i: (0, i, 0)),
        compiler_params=pltpu.CompilerParams(
            dimension_semantics=("parallel",)),
        cost_estimate=pl.CostEstimate(
            flops=3 * n_bits * padded,
            transcendentals=0,
            bytes_accessed=(4 + n_bits * out_itemsize) * padded),
    )(x2)

    bits = out.reshape(n_bits, padded)
    if padded != n:
        bits = bits[:, :n]
    return [bits[i].reshape(orig_shape) for i in range(n_bits)]


def _sawb_multibit_ref(x, n_bits=2, base_w=None):
    """Pure-jnp reference of the PyTorch forward (value semantics)."""
    base = float(base_w) if base_w is not None else (
        2.0 ** (n_bits - 1) / (2.0 ** n_bits - 1.0))
    remain = x.astype(jnp.float32)
    outs = []
    for _ in range(n_bits):
        bit = (remain >= base).astype(jnp.float32)
        outs.append(bit)
        remain = remain - bit * base
        base = base / 2.0
    return outs


if __name__ == "__main__":
    # SAWB_MultiBit has no learned parameters; n_bits=2 as in the ImageNet
    # ResNet18 2-bit config. Deterministic synthetic NCHW input.
    key = jax.random.PRNGKey(0)
    x = jax.random.normal(key, (2, 4, 16, 16), dtype=jnp.float32)  # NCHW

    y = sawb_multibit(x, n_bits=2, base_w=None)
    y = [jax.block_until_ready(yi) for yi in y]

    y_ref = _sawb_multibit_ref(x, n_bits=2, base_w=None)
    for got, want in zip(y, y_ref):
        assert got.shape == want.shape and got.dtype == jnp.float32
        assert bool(jnp.all(got == want)), "mismatch vs reference"

    # Also exercise the tiled/multi-block path (size divisible by the block,
    # no pad/slice) and an explicit base_w.
    x_big = jax.random.normal(jax.random.PRNGKey(1), (2, 8, 128, 128),
                              dtype=jnp.float32)  # 2*8*128*128 = 262144 elems
    y_big = sawb_multibit(x_big, n_bits=2, base_w=0.75)
    y_big = [jax.block_until_ready(yi) for yi in y_big]
    y_big_ref = _sawb_multibit_ref(x_big, n_bits=2, base_w=0.75)
    for got, want in zip(y_big, y_big_ref):
        assert bool(jnp.all(got == want)), "mismatch vs reference (big)"

    print("KERNEL_OK")
</pallas_src>

<mosaic_0001>
module attributes {stable_mosaic.version = 11 : i64} {
  func.func @_sawb_multibit_kernel(%arg0: i32, %arg1: memref<8x512xf32, #tpu.memory_space<vmem>>, %arg2: memref<2x8x512xf32, #tpu.memory_space<vmem>>) attributes {dimension_semantics = [#tpu.dimension_semantics<parallel>], iteration_bounds = array<i64: 1>, scalar_prefetch = 0 : i64, scratch_operands = 0 : i64, tpu.core_type = #tpu.core_type<tc>, window_params = [{transform_indices = @transform_0, window_bounds = array<i64: 8, 512>}, {transform_indices = @transform_1, window_bounds = array<i64: 2, 8, 512>}]} {
    %c0 = arith.constant 0 : index
    %c0_0 = arith.constant 0 : index
    %0 = vector.load %arg1[%c0, %c0_0] : memref<8x512xf32, #tpu.memory_space<vmem>>, vector<8x512xf32>
    %cst = arith.constant 0.666666686 : f32
    %1 = vector.broadcast %cst : f32 to vector<8x512xf32>
    %2 = arith.cmpf oge, %0, %1 : vector<8x512xf32>
    %3 = arith.extui %2 : vector<8x512xi1> to vector<8x512xi32>
    %4 = arith.sitofp %3 : vector<8x512xi32> to vector<8x512xf32>
    %c0_1 = arith.constant 0 : index
    %c0_2 = arith.constant 0 : index
    %c0_3 = arith.constant 0 : index
    %5 = vector.load %arg2[%c0_1, %c0_2, %c0_3] : memref<2x8x512xf32, #tpu.memory_space<vmem>>, vector<1x8x512xf32>
    %6 = vector.shape_cast %5 : vector<1x8x512xf32> to vector<8x512xf32>
    %7 = vector.shape_cast %4 : vector<8x512xf32> to vector<1x8x512xf32>
    tpu.vector_store %arg2[%c0_1, %c0_2, %c0_3], %7 {strides = array<i32>} : memref<2x8x512xf32, #tpu.memory_space<vmem>>, vector<1x8x512xf32>,
    %cst_4 = arith.constant 0.666666686 : f32
    %8 = vector.broadcast %cst_4 : f32 to vector<8x512xf32>
    %9 = arith.mulf %4, %8 : vector<8x512xf32>
    %10 = arith.subf %0, %9 : vector<8x512xf32>
    %cst_5 = arith.constant 0.333333343 : f32
    %11 = vector.broadcast %cst_5 : f32 to vector<8x512xf32>
    %12 = arith.cmpf oge, %10, %11 : vector<8x512xf32>
    %13 = arith.extui %12 : vector<8x512xi1> to vector<8x512xi32>
    %14 = arith.sitofp %13 : vector<8x512xi32> to vector<8x512xf32>
    %c1 = arith.constant 1 : index
    %c0_6 = arith.constant 0 : index
    %c0_7 = arith.constant 0 : index
    %15 = vector.load %arg2[%c1, %c0_6, %c0_7] : memref<2x8x512xf32, #tpu.memory_space<vmem>>, vector<1x8x512xf32>
    %16 = vector.shape_cast %15 : vector<1x8x512xf32> to vector<8x512xf32>
    %17 = vector.shape_cast %14 : vector<8x512xf32> to vector<1x8x512xf32>
    tpu.vector_store %arg2[%c1, %c0_6, %c0_7], %17 {strides = array<i32>} : memref<2x8x512xf32, #tpu.memory_space<vmem>>, vector<1x8x512xf32>,
    return
  }
  func.func @transform_0(%arg0: i32) -> (i32, i32) {
    %c0_i32 = arith.constant 0 : i32
    %c0_i32_0 = arith.constant 0 : i32
    return %arg0, %c0_i32 : i32, i32
  }
  func.func @transform_1(%arg0: i32) -> (i32, i32, i32) {
    %c0_i32 = arith.constant 0 : i32
    %c0_i32_0 = arith.constant 0 : i32
    %c0_i32_1 = arith.constant 0 : i32
    return %c0_i32, %arg0, %c0_i32_0 : i32, i32, i32
  }
}

</mosaic_0001>

<bundles_post_ra>
// kernel: tpu_custom_call.1
= control target key start
LH: loop header
LB: loop body
LE: loop exit
PB: predicated region body
PF: predicated region fallthrough
CT: control target
= control target key end

     0   :  { %6 = vsyncpa [#allocation3], 0  ;;  %s183_s0 = inlined_call_operand.hbm [shape: f32[8,512], index: 0, kind: input, shape index: {}]   ;;  %s184_s1 = inlined_call_operand.hbm [shape: f32[2,8,512], index: 1, kind: output, shape index: {}]  }
   0x1   :  { %7 = vsyncpa [#allocation4], 0  ;;  %s144_s6 = smov [#allocation2]   ;;  %s96_s10 = scalar_lea.hbm %s183_s0, 512 }
   0x2   :  { %s14_s7 = sshll.u32 %s144_s6, 4  ;;  %p97_p0 = scmp.ne.s32.totalorder %s183_s0, %s96_s10  ;;  %s15_s7 = int_to_ptr.vmem [resolvable:$true] %s14_s7 }
   0x3   :  { %p100_p1 = scmp.lt.u32.totalorder %s96_s10, %s183_s0 }
   0x5   :  { %p102_p2 = pnand %p100_p1, %p97_p0 }
   0x7   :  { %105 = shalt.err (!%p102_p2)
}
   0x8   :  { %s106_s15 = scalar_lea.vmem %s15_s7, 512  ;;  %p111_p4 = scmp.lt.s32.totalorder %s15_s7, %s15_s7 }
   0x9   :  { %p107_p3 = scmp.ne.s32.totalorder %s15_s7, %s106_s15  ;;  %p112_p5 = scmp.lt.s32.totalorder %s106_s15, %s106_s15 }
   0xb   :  { %p113_p6 = por %p112_p5, %p111_p4 }
   0xd   :  { %p114_p7 = pnand %p113_p6, %p107_p3 }
   0xf   :  { %117 = shalt.err (!%p114_p7)
}
  0x10   :  { %17 = dma.hbm_to_vmem [thread:$0]  %s183_s0, 512, %s15_s7, [#allocation3]  }
  0x11   :  { %140 = dma.done.wait [#allocation3], 512  }
  0x12   :  { %141 = vsyncadd [#allocation3], 4294966784  ;;  %v21_v0 = vld [vmem:[#allocation2] sm:$0xff]  ;;  %v22_v1 = vld [vmem:[#allocation2 + $0x8] sm:$0xff]  ;;  %v145_v3 = vmov 0.0   ;;  %s146_s0 = smov [#allocation5]  }
  0x13   :  { %v23_v2 = vld [vmem:[#allocation2 + $0x10] sm:$0xff]  ;;  %vm25_vm0 = vcmp.ge.f32.partialorder %v21_v0, 0.6666667  ;;  %vm26_vm1 = vcmp.ge.f32.partialorder %v22_v1, 0.6666667  ;;  %v24_v7 = vld [vmem:[#allocation2 + $0x18] sm:$0xff] }
  0x14   :  { %vm27_vm2 = vcmp.ge.f32.partialorder %v23_v2, 0.6666667  ;;  %v83_v4 = vsel %vm25_vm0, 1.0, %v145_v3  ;;  %v84_v5 = vsel %vm26_vm1, 1.0, %v145_v3  ;;  %vm28_vm3 = vcmp.ge.f32.partialorder %v24_v7, 0.6666667 }
  0x15   :  { %v85_v6 = vsel %vm27_vm2, 1.0, %v145_v3  ;;  %37 = vst [vmem:[#allocation5] sm:$0xff] %v83_v4  ;;  %v41_v8 = vmul.f32 0.6666667, %v83_v4  ;;  %38 = vst [vmem:[#allocation5 + $0x8] sm:$0xff] %v84_v5  ;;  %v86_v11 = vsel %vm28_vm3, 1.0, %v145_v3 }
  0x16   :  { %v42_v9 = vmul.f32 0.6666667, %v84_v5  ;;  %39 = vst [vmem:[#allocation5 + $0x10] sm:$0xff] %v85_v6  ;;  %v43_v10 = vmul.f32 0.6666667, %v85_v6  ;;  %40 = vst [vmem:[#allocation5 + $0x18] sm:$0xff] %v86_v11 }
  0x17   :  { %v45_v12 = vsub.f32 %v21_v0, %v41_v8  ;;  %v44_v15 = vmul.f32 0.6666667, %v86_v11  ;;  %s71_s18 = sshll.u32 %s146_s0, 4  ;;  %s72_s18 = int_to_ptr.vmem [resolvable:$true] %s71_s18 }
  0x18   :  { %v46_v13 = vsub.f32 %v22_v1, %v42_v9  ;;  %v47_v14 = vsub.f32 %v23_v2, %v43_v10  ;;  %s118_s19 = scalar_lea.vmem %s72_s18, 1024  ;;  %p123_p9 = scmp.lt.s32.totalorder %s72_s18, %s72_s18 }
  0x19   :  { %vm49_vm4 = vcmp.ge.f32.partialorder %v45_v12, 0.33333334  ;;  %v48_v19 = vsub.f32 %v24_v7, %v44_v15  ;;  %p119_p8 = scmp.ne.s32.totalorder %s72_s18, %s118_s19  ;;  %p124_p10 = scmp.lt.s32.totalorder %s118_s19, %s118_s19 }
  0x1a   :  { %vm50_vm5 = vcmp.ge.f32.partialorder %v46_v13, 0.33333334  ;;  %vm51_vm6 = vcmp.ge.f32.partialorder %v47_v14, 0.33333334  ;;  %v87_v16 = vsel %vm49_vm4, 1.0, %v145_v3 }
  0x1b   :  { %v88_v17 = vsel %vm50_vm5, 1.0, %v145_v3  ;;  %v89_v18 = vsel %vm51_vm6, 1.0, %v145_v3  ;;  %62 = vst [vmem:[#allocation5 + $0x20] sm:$0xff] %v87_v16  ;;  %vm52_vm7 = vcmp.ge.f32.partialorder %v48_v19, 0.33333334  ;;  %p125_p11 = por %p124_p10, %p123_p9 }
  0x1c   :  { %63 = vst [vmem:[#allocation5 + $0x28] sm:$0xff] %v88_v17  ;;  %64 = vst [vmem:[#allocation5 + $0x30] sm:$0xff] %v89_v18  ;;  %v90_v20 = vsel %vm52_vm7, 1.0, %v145_v3 }
  0x1d   :  { %65 = vst [vmem:[#allocation5 + $0x38] sm:$0xff] %v90_v20  ;;  %p126_p12 = pnand %p125_p11, %p119_p8 }
  0x1f   :  { %129 = shalt.err (!%p126_p12)
}
  0x20   :  { %s130_s22 = scalar_lea.hbm %s184_s1, 1024 }
  0x21   :  { %p131_p13 = scmp.ne.s32.totalorder %s184_s1, %s130_s22  ;;  %p134_p0 = scmp.lt.u32.totalorder %s130_s22, %s184_s1 }
  0x23   :  { %p136_p1 = pnand %p134_p0, %p131_p13 }
  0x25   :  { %139 = shalt.err (!%p136_p1)
}
  0x26   :  { %s147_s27 = smov 512   ;;  %s148_s28 = smov 32  }
  0x27   :  { %77 = dma.vmem_to_hbm [thread:$0]  %s72_s18, 1024, %s184_s1, [#allocation4], %s147_s27, %s147_s27, %s148_s28  }
  0x28   :  { %142 = dma.done.wait [#allocation4], 1024  }
  0x29   :  { %143 = vsyncadd [#allocation4], 4294966272 }
  0x2a   :  { %81 = vsyncpa [#allocation3], 1 }
  0x2b   :  { %82 = vsyncpa [#allocation4], 1 }

</bundles_post_ra>
